<compile_context>
chip_gen: v5e
topology: v5e:2x2
jax: 0.10.0
libtpu: 0.0.40
codegen_flags: <defaults>
</compile_context>

<pallas_src>
import jax
import jax.numpy as jnp
from jax.experimental import pallas as pl
from jax.experimental.pallas import tpu as pltpu


def _identity_kernel(x_ref, o_ref):
    # The whole "forward" of DoNothing: out = x.
    o_ref[...] = x_ref[...]


def _lane_dense_2d(shape, total):
    """Pick a (rows, cols) factorization of `total` with lane-dense cols."""
    # Prefer a lane width that is a multiple of 128 and divides the total.
    for lanes in (1024, 512, 256, 128):
        if total % lanes == 0:
            return total // lanes, lanes
    # Fallback: merge trailing dims until the lane dim is >= 128
    # (a trailing-suffix product always divides the total exactly).
    cols = 1
    for d in reversed(shape):
        cols *= d
        if cols >= 128:
            return total // cols, cols
    return 1, total


# ~2 MiB per block: 2 buffers (double-buffer) x 2 arrays (in + out) x 2 MiB
# = 8 MiB of VMEM, comfortably under every generation's default scoped limit.
_BLOCK_BYTE_BUDGET = 2 * 1024 * 1024


def do_nothing(x: jax.Array) -> jax.Array:
    """Identity forward pass (DoNothing.forward) via a Pallas TPU kernel."""
    orig_shape = x.shape
    dtype = x.dtype
    total = x.size

    if total == 0:
        return x  # nothing to copy

    R, C = _lane_dense_2d(orig_shape, total)
    x2 = x.reshape(R, C)

    itemsize = jnp.dtype(dtype).itemsize
    cost = pl.CostEstimate(
        flops=0, transcendentals=0, bytes_accessed=2 * total * itemsize
    )

    # Byte-budgeted row tile (multiple of 8 sublanes).
    row_bytes = max(C * itemsize, 1)
    tr = max(8, (_BLOCK_BYTE_BUDGET // row_bytes) // 8 * 8)

    if R <= tr:
        # Whole lane-dense array fits in a single block: grid-less call,
        # no pipeline setup, output aliased onto the input buffer.
        out2 = pl.pallas_call(
            _identity_kernel,
            out_shape=jax.ShapeDtypeStruct((R, C), dtype),
            input_output_aliases={0: 0},
            cost_estimate=cost,
        )(x2)
    else:
        grid_r = pl.cdiv(R, tr)
        out2 = pl.pallas_call(
            _identity_kernel,
            out_shape=jax.ShapeDtypeStruct((R, C), dtype),
            grid=(grid_r,),
            in_specs=[pl.BlockSpec((tr, C), lambda i: (i, 0))],
            out_specs=pl.BlockSpec((tr, C), lambda i: (i, 0)),
            input_output_aliases={0: 0},
            compiler_params=pltpu.CompilerParams(
                dimension_semantics=("parallel",),
                # ~8 MiB actually used; 32 MiB ceiling is safe on v5e/v6e/v7x.
                vmem_limit_bytes=32 * 1024 * 1024,
            ),
            cost_estimate=cost,
        )(x2)

    return out2.reshape(orig_shape)


if __name__ == "__main__":
    key = jax.random.PRNGKey(0)

    # Small NCHW input consistent with a generic conv-style module input.
    x = jax.random.normal(key, (2, 4, 16, 16), dtype=jnp.float32)
    y = jax.block_until_ready(do_nothing(x))
    assert y.shape == x.shape and y.dtype == x.dtype
    assert bool(jnp.all(y == x)), "identity kernel output mismatch (f32 NCHW)"

    # Odd shape exercising the trailing-dim-merge fallback (total % 128 != 0).
    x_odd = jax.random.normal(jax.random.PRNGKey(1), (3, 5, 50), dtype=jnp.float32)
    y_odd = jax.block_until_ready(do_nothing(x_odd))
    assert y_odd.shape == x_odd.shape and bool(jnp.all(y_odd == x_odd)), "fallback path mismatch"

    # bf16 input through the same path.
    x_bf = jax.random.normal(jax.random.PRNGKey(2), (2, 4, 16, 16)).astype(jnp.bfloat16)
    y_bf = jax.block_until_ready(do_nothing(x_bf))
    assert y_bf.dtype == jnp.bfloat16 and bool(jnp.all(y_bf == x_bf)), "bf16 path mismatch"

    print("KERNEL_OK")
</pallas_src>

<mosaic_0001>
module attributes {stable_mosaic.version = 11 : i64} {
  func.func @_identity_kernel(%arg0: memref<2x1024xf32, #tpu.memory_space<vmem>>, %arg1: memref<2x1024xf32, #tpu.memory_space<vmem>>) attributes {dimension_semantics = [], scalar_prefetch = 0 : i64, scratch_operands = 0 : i64, tpu.core_type = #tpu.core_type<tc>} {
    %c0 = arith.constant 0 : index
    %c0_0 = arith.constant 0 : index
    %0 = vector.load %arg0[%c0, %c0_0] : memref<2x1024xf32, #tpu.memory_space<vmem>>, vector<2x1024xf32>
    %c0_1 = arith.constant 0 : index
    %c0_2 = arith.constant 0 : index
    %1 = vector.load %arg1[%c0_1, %c0_2] : memref<2x1024xf32, #tpu.memory_space<vmem>>, vector<2x1024xf32>
    tpu.vector_store %arg1[%c0_1, %c0_2], %0 {strides = array<i32>} : memref<2x1024xf32, #tpu.memory_space<vmem>>, vector<2x1024xf32>,
    return
  }
}

</mosaic_0001>

<bundles_post_ra>
// kernel: tpu_custom_call.1
= control target key start
LH: loop header
LB: loop body
LE: loop exit
PB: predicated region body
PF: predicated region fallthrough
CT: control target
= control target key end

     0   :  { %6 = vsyncpa [#allocation3], 0  ;;  %s116_s0 = inlined_call_operand.hbm [shape: f32[2,1024], index: 0, kind: input, shape index: {}, may-alias: {0,1}]   ;;  %s117_s1 = inlined_call_operand.hbm [shape: f32[2,1024], index: 1, kind: output, shape index: {}, may-alias: {0,1}]  }
   0x1   :  { %7 = vsyncpa [#allocation4], 0  ;;  %s13_s8 = sshll.u32 %s116_s0, 4  ;;  %s98_s9 = smov [#allocation2]   ;;  %s14_s8 = int_to_ptr.hbm [resolvable:$true] %s13_s8 }
   0x2   :  { %s15_s10 = sshll.u32 %s98_s9, 4  ;;  %s16_s10 = int_to_ptr.vmem [resolvable:$true] %s15_s10 }
   0x3   :  { %18 = dma.hbm_to_vmem [thread:$0]  %s14_s8, 256, %s16_s10, [#allocation3]  }
   0x4   :  { %94 = dma.done.wait [#allocation3], 256  }
   0x5   :  { %95 = vsyncadd [#allocation3], 4294967040  ;;  %s99_s11 = smov [#allocation5]   ;;  %s34_s15 = sshll.u32 %s117_s1, 4  ;;  %v23_v0 = vld [vmem:[#allocation2] sm:$0xff]  ;;  %v24_v1 = vld [vmem:[#allocation2 + $0x8] sm:$0xff]  ;;  %s35_s15 = int_to_ptr.hbm [resolvable:$true] %s34_s15 }
   0x6   :  { %s32_s12 = sshll.u32 %s99_s11, 4  ;;  %25 = vst [vmem:[#allocation5] sm:$0xff] %v23_v0  ;;  %s33_s12 = int_to_ptr.vmem [resolvable:$true] %s32_s12 }
   0x7   :  { %26 = vst [vmem:[#allocation5 + $0x8] sm:$0xff] %v24_v1 }
   0x8   :  { %37 = dma.vmem_to_hbm [thread:$0]  %s33_s12, 256, %s35_s15, [#allocation4]  }
   0x9   :  { %96 = dma.done.wait [#allocation4], 256  }
   0xa   :  { %97 = vsyncadd [#allocation4], 4294967040 }
   0xb   :  { %42 = vsyncpa [#allocation3], 1 }
   0xc   :  { %43 = vsyncpa [#allocation4], 1 }

</bundles_post_ra>
